<compile_context>
chip_gen: v5e
topology: v5e:2x2
jax: 0.10.0
libtpu: 0.0.40
codegen_flags: <defaults>
</compile_context>

<pallas_src>
import jax
import jax.numpy as jnp
from jax.experimental import pallas as pl
from jax.experimental.pallas import tpu as pltpu

LANE = 128
SUBLANE = 8
MAX_TILE_B = 512


def _round_up(n: int, m: int) -> int:
    return ((n + m - 1) // m) * m


def _vmem_cap_bytes() -> int:
    """Generation-aware VMEM cap: physical VMEM minus headroom.

    v5e/v6e (128 MiB) -> ~112 MiB; v7x (64 MiB) -> ~56 MiB.
    Falls back to the conservative v7x value if the query is unavailable.
    """
    try:
        phys = int(pltpu.get_tpu_info().vmem_capacity_bytes)
    except Exception:  # pragma: no cover - host/backends without the query
        phys = 64 << 20
    return max(phys - max(8 << 20, phys // 8), 16 << 20)


def _choose_batch_tiling(batch: int):
    """Pick (tile_b, padded_batch) bounding pad waste to <8 rows per tile and
    keeping >= 2 grid steps when batch >= 16 (v7x dual-TensorCore)."""
    n_tiles = pl.cdiv(batch, MAX_TILE_B)
    if n_tiles == 1 and batch >= 16:
        n_tiles = 2
    tile_b = _round_up(pl.cdiv(batch, n_tiles), SUBLANE)
    padded_batch = n_tiles * tile_b
    return tile_b, padded_batch


def make_mlp_kernel(n_layers: int, head: str, valid_out: int, mxu_dtype):
    """Fused MLP kernel.

    Ref order: (x, W0, b0, ..., W{n-1}, b{n-1}, out).
    x/W are `mxu_dtype` (bf16 for classification, f32 for regression);
    biases are f32; accumulation and the ReLU / sigmoid / softmax epilogue
    run in f32. `valid_out` = true (un-padded) output width, used to mask
    padded lanes out of the softmax denominator.
    """
    precision = (jax.lax.Precision.HIGHEST
                 if mxu_dtype == jnp.float32 else None)

    def kernel(*refs):
        x_ref = refs[0]
        out_ref = refs[-1]
        wb = refs[1:-1]

        h = x_ref[...]                                    # (TILE_B, in)
        for i in range(n_layers):
            w = wb[2 * i][...]                            # (in_pad, out_pad)
            b = wb[2 * i + 1][...]                        # f32 (1, out_pad)
            acc = jnp.dot(h, w, preferred_element_type=jnp.float32,
                          precision=precision) + b
            if i < n_layers - 1:
                acc = jnp.maximum(acc, 0.0)               # ReLU in f32 (VPU)
                h = acc.astype(mxu_dtype)                 # back into the MXU
            else:
                h = acc                                   # f32 logits

        if head == "sigmoid":
            h = pl.reciprocal(1.0 + jnp.exp(-h), approx=True)
        elif head == "softmax":
            # Mask padded lanes so they do not pollute the softmax denominator.
            lane = jax.lax.broadcasted_iota(jnp.int32, h.shape, dimension=1)
            h = jnp.where(lane < valid_out, h, -jnp.inf)
            m = jnp.max(h, axis=1, keepdims=True)
            e = jnp.exp(h - m)
            h = e * pl.reciprocal(jnp.sum(e, axis=1, keepdims=True), approx=True)
        # head == "none": regression, identity.

        out_ref[...] = h.astype(out_ref.dtype)

    return kernel


def prepare_params(weights, biases, *, is_classification=True):
    """One-time padding / casting of the weight set (hoisted out of forward).

    weights[i]: (in_i, out_i) f32; biases[i]: (out_i,) f32.
    Returns (packed_wb, meta): interleaved padded [W0, b0, W1, b1, ...] plus
    static metadata for the forward pass.
    """
    assert len(weights) == len(biases)
    n_layers = len(weights)
    input_size = weights[0].shape[0]
    output_size = weights[-1].shape[1]

    if is_classification and output_size == 1:
        head = "sigmoid"
    elif is_classification and output_size > 1:
        head = "softmax"
    else:
        head = "none"

    # bf16 MXU inputs for classification; f32 path for regression accuracy.
    compute_dtype = jnp.bfloat16 if is_classification else jnp.float32

    # Lane-align hidden/output feature dims once.  The *input* feature dim is
    # NOT padded (block dim == full array dim is legal; Mosaic pads K
    # internally), avoiding HBM read inflation for tiny input_size.
    dims = [input_size] + [w.shape[1] for w in weights]
    pdims = [input_size] + [_round_up(d, LANE) for d in dims[1:]]

    packed = []
    for k, (w, b) in enumerate(zip(weights, biases)):
        d_in, d_out = w.shape
        w_p = jnp.pad(
            w, ((0, pdims[k] - d_in), (0, pdims[k + 1] - d_out))
        ).astype(compute_dtype)
        b_p = jnp.pad(b, (0, pdims[k + 1] - d_out)).reshape(1, -1).astype(jnp.float32)
        packed += [w_p, b_p]

    meta = dict(n_layers=n_layers, head=head, input_size=input_size,
                output_size=output_size, pdims=pdims,
                compute_dtype=compute_dtype)
    return packed, meta


def dynamic_fc_forward_prepared(x, packed_wb, meta):
    """Pallas forward using pre-padded params (no per-call weight pad/cast)."""
    batch, input_size = x.shape
    assert input_size == meta["input_size"]
    n_layers = meta["n_layers"]
    head = meta["head"]
    output_size = meta["output_size"]
    pdims = meta["pdims"]
    compute_dtype = meta["compute_dtype"]

    tile_b, padded_batch = _choose_batch_tiling(batch)
    grid = (padded_batch // tile_b,)

    x_p = x
    if padded_batch != batch:
        x_p = jnp.pad(x, ((0, padded_batch - batch), (0, 0)))
    x_p = x_p.astype(compute_dtype)

    # x: batch-tiled, auto double-buffered.  Weights/biases: constant
    # index_map (VMEM-resident), single-buffered via pl.Buffered(1).
    in_specs = [pl.BlockSpec((tile_b, input_size), lambda i: (i, 0))]
    for k in range(n_layers):
        in_specs += [
            pl.BlockSpec((pdims[k], pdims[k + 1]), lambda i: (0, 0),
                         pipeline_mode=pl.Buffered(1)),
            pl.BlockSpec((1, pdims[k + 1]), lambda i: (0, 0),
                         pipeline_mode=pl.Buffered(1)),
        ]

    out_pad = pdims[-1]
    out_dtype = jnp.bfloat16 if head in ("sigmoid", "softmax") else jnp.float32
    out_shape = jax.ShapeDtypeStruct((padded_batch, out_pad), out_dtype)
    out_specs = pl.BlockSpec((tile_b, out_pad), lambda i: (i, 0))

    # VMEM budget: single-buffered resident weights + double-buffered x/out
    # tiles + per-layer intermediate temporaries (f32 acc + recast, two live),
    # capped generation-aware below physical VMEM.
    x_item = jnp.dtype(compute_dtype).itemsize
    out_item = jnp.dtype(out_dtype).itemsize
    weight_bytes = sum(int(a.size) * a.dtype.itemsize for a in packed_wb)
    io_bytes = 2 * tile_b * input_size * x_item + 2 * tile_b * out_pad * out_item
    interm_bytes = 2 * tile_b * max(pdims) * (4 + x_item)
    vmem_needed = weight_bytes + io_bytes + interm_bytes + (4 << 20)
    vmem_limit = int(min(max(vmem_needed, 16 << 20), _vmem_cap_bytes()))
    # TODO(synk): if vmem_needed exceeds the cap (very wide layers, esp. v7x's
    # 64 MiB), fall back to a K/N-tiled grid that streams weight blocks
    # instead of keeping every layer resident.

    kernel = make_mlp_kernel(n_layers, head, output_size, compute_dtype)

    out_padded = pl.pallas_call(
        kernel,
        grid=grid,
        out_shape=out_shape,
        in_specs=in_specs,
        out_specs=out_specs,
        compiler_params=pltpu.CompilerParams(
            dimension_semantics=("parallel",),
            vmem_limit_bytes=vmem_limit,
        ),
    )(x_p, *packed_wb)

    # Free XLA plumbing back to the logical (batch, output_size) shape.
    return out_padded[:batch, :output_size].astype(x.dtype)


def dynamic_fc_forward(x, weights, biases, *, is_classification=True):
    """Convenience one-shot API (prefer prepare_params + *_prepared in loops)."""
    packed, meta = prepare_params(weights, biases,
                                  is_classification=is_classification)
    return dynamic_fc_forward_prepared(x, packed, meta)


def init_params(key, input_size, hidden_size, output_size, n_layers):
    """nn.Linear-style init: U(-1/sqrt(fan_in), 1/sqrt(fan_in))."""
    dims = [input_size] + [hidden_size] * (n_layers - 1) + [output_size]
    weights, biases = [], []
    for i in range(len(dims) - 1):
        fan_in, fan_out = dims[i], dims[i + 1]
        key, kw, kb = jax.random.split(key, 3)
        bound = 1.0 / jnp.sqrt(jnp.float32(fan_in))
        weights.append(
            jax.random.uniform(kw, (fan_in, fan_out), jnp.float32, -bound, bound))
        biases.append(
            jax.random.uniform(kb, (fan_out,), jnp.float32, -bound, bound))
    return weights, biases


def reference_forward(x, weights, biases, *, is_classification=True):
    """Pure-JAX f32 reference mirroring the PyTorch forward."""
    h = x
    for i, (w, b) in enumerate(zip(weights, biases)):
        h = h @ w + b
        if i < len(weights) - 1:
            h = jnp.maximum(h, 0.0)
    output_size = weights[-1].shape[1]
    if is_classification and output_size == 1:
        h = jax.nn.sigmoid(h)
    elif is_classification and output_size > 1:
        h = jax.nn.softmax(h, axis=1)
    return h


if __name__ == "__main__":
    key = jax.random.PRNGKey(0)

    def run_case(name, batch, input_size, hidden_size, output_size, n_layers,
                 is_classification, key):
        key, kx, kp = jax.random.split(key, 3)
        x = jax.random.normal(kx, (batch, input_size), jnp.float32)
        weights, biases = init_params(kp, input_size, hidden_size,
                                      output_size, n_layers)
        packed, meta = prepare_params(weights, biases,
                                      is_classification=is_classification)
        out = jax.block_until_ready(dynamic_fc_forward_prepared(x, packed, meta))
        ref = reference_forward(x, weights, biases,
                                is_classification=is_classification)
        assert out.shape == (batch, output_size), (name, out.shape)
        err = float(jnp.max(jnp.abs(out - ref)))
        # bf16 MXU inputs + approx reciprocal -> loosened tolerance vs f32 ref.
        assert err < 3e-2, f"{name}: max abs err {err}"
        return key

    # Binary classification (module defaults): Linear -> ReLU x2 -> Linear -> sigmoid.
    key = run_case("sigmoid", 8, 16, 32, 1, 3, True, key)
    # Multiclass softmax head; batch=100 exercises the 2-step batch grid,
    # row padding and padded-lane masking.
    key = run_case("softmax", 100, 16, 32, 4, 3, True, key)
    # Regression (identity head), f32 path.
    key = run_case("regression", 8, 16, 32, 2, 3, False, key)

    print("KERNEL_OK")
</pallas_src>

<mosaic_0001>
module attributes {stable_mosaic.version = 11 : i64} {
  func.func @kernel(%arg0: i32, %arg1: memref<8x16xbf16, #tpu.memory_space<vmem>>, %arg2: memref<16x128xbf16, #tpu.memory_space<vmem>>, %arg3: memref<1x128xf32, #tpu.memory_space<vmem>>, %arg4: memref<128x128xbf16, #tpu.memory_space<vmem>>, %arg5: memref<1x128xf32, #tpu.memory_space<vmem>>, %arg6: memref<128x128xbf16, #tpu.memory_space<vmem>>, %arg7: memref<1x128xf32, #tpu.memory_space<vmem>>, %arg8: memref<8x128xbf16, #tpu.memory_space<vmem>>) attributes {dimension_semantics = [#tpu.dimension_semantics<parallel>], iteration_bounds = array<i64: 1>, scalar_prefetch = 0 : i64, scratch_operands = 0 : i64, tpu.core_type = #tpu.core_type<tc>, window_params = [{transform_indices = @transform_0, window_bounds = array<i64: 8, 16>}, {pipeline_mode = #tpu.pipeline_mode<synchronous>, transform_indices = @transform_1, window_bounds = array<i64: 16, 128>}, {pipeline_mode = #tpu.pipeline_mode<synchronous>, transform_indices = @transform_2, window_bounds = array<i64: 1, 128>}, {pipeline_mode = #tpu.pipeline_mode<synchronous>, transform_indices = @transform_3, window_bounds = array<i64: 128, 128>}, {pipeline_mode = #tpu.pipeline_mode<synchronous>, transform_indices = @transform_4, window_bounds = array<i64: 1, 128>}, {pipeline_mode = #tpu.pipeline_mode<synchronous>, transform_indices = @transform_5, window_bounds = array<i64: 128, 128>}, {pipeline_mode = #tpu.pipeline_mode<synchronous>, transform_indices = @transform_6, window_bounds = array<i64: 1, 128>}, {transform_indices = @transform_7, window_bounds = array<i64: 8, 128>}]} {
    %c0 = arith.constant 0 : index
    %c0_0 = arith.constant 0 : index
    %0 = vector.load %arg1[%c0, %c0_0] : memref<8x16xbf16, #tpu.memory_space<vmem>>, vector<8x16xbf16>
    %c0_1 = arith.constant 0 : index
    %c0_2 = arith.constant 0 : index
    %1 = vector.load %arg2[%c0_1, %c0_2] : memref<16x128xbf16, #tpu.memory_space<vmem>>, vector<16x128xbf16>
    %c0_3 = arith.constant 0 : index
    %c0_4 = arith.constant 0 : index
    %2 = vector.load %arg3[%c0_3, %c0_4] : memref<1x128xf32, #tpu.memory_space<vmem>>, vector<1x128xf32>
    %cst = arith.constant dense<0.000000e+00> : vector<8x128xf32>
    %3 = tpu.matmul %0, %1, %cst {dimension_numbers = #tpu.dot_dimension_numbers<[1], [0], [0], [1], [0, 0, 1, 1], [], []>} : vector<8x16xbf16>, vector<16x128xbf16>, vector<8x128xf32> -> vector<8x128xf32>
    %4 = vector.broadcast %2 : vector<1x128xf32> to vector<8x128xf32>
    %5 = arith.addf %3, %4 : vector<8x128xf32>
    %cst_5 = arith.constant 0.000000e+00 : f32
    %6 = vector.broadcast %cst_5 : f32 to vector<8x128xf32>
    %7 = arith.maximumf %5, %6 : vector<8x128xf32>
    %8 = arith.truncf %7 : vector<8x128xf32> to vector<8x128xbf16>
    %c0_6 = arith.constant 0 : index
    %c0_7 = arith.constant 0 : index
    %9 = vector.load %arg4[%c0_6, %c0_7] : memref<128x128xbf16, #tpu.memory_space<vmem>>, vector<128x128xbf16>
    %c0_8 = arith.constant 0 : index
    %c0_9 = arith.constant 0 : index
    %10 = vector.load %arg5[%c0_8, %c0_9] : memref<1x128xf32, #tpu.memory_space<vmem>>, vector<1x128xf32>
    %cst_10 = arith.constant dense<0.000000e+00> : vector<8x128xf32>
    %11 = tpu.matmul %8, %9, %cst_10 {dimension_numbers = #tpu.dot_dimension_numbers<[1], [0], [0], [1], [0, 0, 1, 1], [], []>} : vector<8x128xbf16>, vector<128x128xbf16>, vector<8x128xf32> -> vector<8x128xf32>
    %12 = vector.broadcast %10 : vector<1x128xf32> to vector<8x128xf32>
    %13 = arith.addf %11, %12 : vector<8x128xf32>
    %cst_11 = arith.constant 0.000000e+00 : f32
    %14 = vector.broadcast %cst_11 : f32 to vector<8x128xf32>
    %15 = arith.maximumf %13, %14 : vector<8x128xf32>
    %16 = arith.truncf %15 : vector<8x128xf32> to vector<8x128xbf16>
    %c0_12 = arith.constant 0 : index
    %c0_13 = arith.constant 0 : index
    %17 = vector.load %arg6[%c0_12, %c0_13] : memref<128x128xbf16, #tpu.memory_space<vmem>>, vector<128x128xbf16>
    %c0_14 = arith.constant 0 : index
    %c0_15 = arith.constant 0 : index
    %18 = vector.load %arg7[%c0_14, %c0_15] : memref<1x128xf32, #tpu.memory_space<vmem>>, vector<1x128xf32>
    %cst_16 = arith.constant dense<0.000000e+00> : vector<8x128xf32>
    %19 = tpu.matmul %16, %17, %cst_16 {dimension_numbers = #tpu.dot_dimension_numbers<[1], [0], [0], [1], [0, 0, 1, 1], [], []>} : vector<8x128xbf16>, vector<128x128xbf16>, vector<8x128xf32> -> vector<8x128xf32>
    %20 = vector.broadcast %18 : vector<1x128xf32> to vector<8x128xf32>
    %21 = arith.addf %19, %20 : vector<8x128xf32>
    %cst_17 = arith.constant 0.000000e+00 : f32
    %22 = vector.broadcast %cst_17 : f32 to vector<8x128xf32>
    %23 = arith.subf %22, %21 : vector<8x128xf32>
    %24 = math.exp %23 : vector<8x128xf32>
    %cst_18 = arith.constant 1.000000e+00 : f32
    %25 = vector.broadcast %cst_18 : f32 to vector<8x128xf32>
    %26 = arith.addf %25, %24 : vector<8x128xf32>
    %27 = tpu.reciprocal %26 {approx = true} : vector<8x128xf32> -> vector<8x128xf32>
    %28 = arith.truncf %27 : vector<8x128xf32> to vector<8x128xbf16>
    %c0_19 = arith.constant 0 : index
    %c0_20 = arith.constant 0 : index
    %29 = vector.load %arg8[%c0_19, %c0_20] : memref<8x128xbf16, #tpu.memory_space<vmem>>, vector<8x128xbf16>
    tpu.vector_store %arg8[%c0_19, %c0_20], %28 {strides = array<i32>} : memref<8x128xbf16, #tpu.memory_space<vmem>>, vector<8x128xbf16>,
    return
  }
  func.func @transform_0(%arg0: i32) -> (i32, i32) {
    %c0_i32 = arith.constant 0 : i32
    %c0_i32_0 = arith.constant 0 : i32
    return %arg0, %c0_i32 : i32, i32
  }
  func.func @transform_1(%arg0: i32) -> (i32, i32) {
    %c0_i32 = arith.constant 0 : i32
    %c0_i32_0 = arith.constant 0 : i32
    %c0_i32_1 = arith.constant 0 : i32
    return %c0_i32, %c0_i32_0 : i32, i32
  }
  func.func @transform_2(%arg0: i32) -> (i32, i32) {
    %c0_i32 = arith.constant 0 : i32
    %c0_i32_0 = arith.constant 0 : i32
    %c0_i32_1 = arith.constant 0 : i32
    return %c0_i32, %c0_i32_0 : i32, i32
  }
  func.func @transform_3(%arg0: i32) -> (i32, i32) {
    %c0_i32 = arith.constant 0 : i32
    %c0_i32_0 = arith.constant 0 : i32
    %c0_i32_1 = arith.constant 0 : i32
    return %c0_i32, %c0_i32_0 : i32, i32
  }
  func.func @transform_4(%arg0: i32) -> (i32, i32) {
    %c0_i32 = arith.constant 0 : i32
    %c0_i32_0 = arith.constant 0 : i32
    %c0_i32_1 = arith.constant 0 : i32
    return %c0_i32, %c0_i32_0 : i32, i32
  }
  func.func @transform_5(%arg0: i32) -> (i32, i32) {
    %c0_i32 = arith.constant 0 : i32
    %c0_i32_0 = arith.constant 0 : i32
    %c0_i32_1 = arith.constant 0 : i32
    return %c0_i32, %c0_i32_0 : i32, i32
  }
  func.func @transform_6(%arg0: i32) -> (i32, i32) {
    %c0_i32 = arith.constant 0 : i32
    %c0_i32_0 = arith.constant 0 : i32
    %c0_i32_1 = arith.constant 0 : i32
    return %c0_i32, %c0_i32_0 : i32, i32
  }
  func.func @transform_7(%arg0: i32) -> (i32, i32) {
    %c0_i32 = arith.constant 0 : i32
    %c0_i32_0 = arith.constant 0 : i32
    return %arg0, %c0_i32 : i32, i32
  }
}

</mosaic_0001>

<bundles_post_ra>
// kernel: tpu_custom_call.1
= control target key start
LH: loop header
LB: loop body
LE: loop exit
PB: predicated region body
PF: predicated region fallthrough
CT: control target
= control target key end

     0   :  { %12 = vsyncpa [#allocation3], 0  ;;  %s610_s0 = inlined_call_operand.hbm [shape: bf16[8,16], index: 0, kind: input, shape index: {}]   ;;  %s611_s1 = inlined_call_operand.hbm [shape: bf16[16,128], index: 1, kind: input, shape index: {}]   ;;  %s612_s2 = inlined_call_operand.vmem [shape: f32[1,128], index: 2, kind: input, shape index: {}]   ;;  %s613_s3 = inlined_call_operand.hbm [shape: bf16[128,128], index: 3, kind: input, shape index: {}]   ;;  %s614_s4 = inlined_call_operand.vmem [shape: f32[1,128], index: 4, kind: input, shape index: {}]   ;;  %s615_s5 = inlined_call_operand.hbm [shape: bf16[128,128], index: 5, kind: input, shape index: {}]   ;;  %s616_s6 = inlined_call_operand.vmem [shape: f32[1,128], index: 6, kind: input, shape index: {}]   ;;  %s617_s7 = inlined_call_operand.hbm [shape: bf16[8,128], index: 7, kind: output, shape index: {}]  }
   0x1   :  { %13 = vsyncpa [#allocation6], 0 }
   0x2   :  { %14 = vsyncpa [#allocation9], 0  ;;  %s31_s26 = sshll.u32 %s611_s1, 4  ;;  %s32_s26 = int_to_ptr.hbm [resolvable:$true] %s31_s26 }
   0x3   :  { %15 = vsyncpa [#allocation4], 0  ;;  %s539_s27 = smov [#allocation5]   ;;  %s21_s8 = sshll.u32 %s610_s0, 4  ;;  %s22_s8 = int_to_ptr.hbm [resolvable:$true] %s21_s8 }
   0x4   :  { %s33_s28 = sshll.u32 %s539_s27, 4  ;;  %s540_s9 = smov 64   ;;  %s34_s28 = int_to_ptr.vmem [resolvable:$true] %s33_s28 }
   0x5   :  { %s541_s10 = smov 4   ;;  %s542_s11 = smov [#allocation2]  }
   0x6   :  { %39 = dma.hbm_to_vmem [thread:$0]  %s32_s26, 128, %s34_s28, [#allocation6], %s540_s9, %s540_s9, %s541_s10  }
   0x7   :  { %s23_s12 = sshll.u32 %s542_s11, 4  ;;  %s46_s15 = sshll.u32 %s613_s3, 4  ;;  %s24_s12 = int_to_ptr.vmem [resolvable:$true] %s23_s12  ;;  %s47_s15 = int_to_ptr.hbm [resolvable:$true] %s46_s15 }
   0x8   :  { %26 = dma.hbm_to_vmem [thread:$0]  %s22_s8, 64, %s24_s12, [#allocation3]  }
   0x9   :  { %s61_s17 = sshll.u32 %s615_s5, 4  ;;  %s543_s18 = smov [#allocation7]   ;;  %s62_s17 = int_to_ptr.hbm [resolvable:$true] %s61_s17 }
   0xa   :  { %s48_s19 = sshll.u32 %s543_s18, 4  ;;  %s544_s0 = smov [#allocation8]   ;;  %s49_s19 = int_to_ptr.vmem [resolvable:$true] %s48_s19 }
   0xb   :  { %54 = dma.hbm_to_vmem [thread:$0]  %s47_s15, 1024, %s49_s19, [#allocation6], %s540_s9, %s540_s9, %s541_s10  }
   0xc   :  { %s63_s20 = sshll.u32 %s544_s0, 4  ;;  %s64_s20 = int_to_ptr.vmem [resolvable:$true] %s63_s20 }
   0xd   :  { %69 = dma.hbm_to_vmem [thread:$0]  %s62_s17, 1024, %s64_s20, [#allocation9], %s540_s9, %s540_s9, %s541_s10  }
   0xe   :  { %531 = dma.done.wait [#allocation3], 64  }
   0xf   :  { %532 = vsyncadd [#allocation3], 4294967232 }
  0x10   :  { %533 = dma.done.wait [#allocation6], 1152  }
  0x11   :  { %534 = vsyncadd [#allocation6], 4294966144 }
  0x12   :  { %535 = dma.done.wait [#allocation9], 1024  }
  0x13   :  { %536 = vsyncadd [#allocation9], 4294966272  ;;  %v380_v0 = vld [vmem:[#allocation5] sm:$0xff]  ;;  %v89_v2 = vld [vmem:[#allocation2] sm:$0xf]  ;;  %vm102_vm0 = vcmask 130048  }
  0x14   :  { %v388_v1 = vld [vmem:[#allocation7 + $0x38] sm:$0xff]  ;;  %113 = vmatpush.bf16.msra.mxu0 %v380_v0  ;;  %v387_v3 = vld [vmem:[#allocation7 + $0x30] sm:$0xff]  ;;  %v386_v4 = vld [vmem:[#allocation7 + $0x28] sm:$0xff]  ;;  %s299_s27 = sshll.u32 %s617_s7, 4  ;;  %s300_s27 = int_to_ptr.hbm [resolvable:$true] %s299_s27 }
  0x15   :  { %189 = vmatpush.bf16.msra.mxu1 %v388_v1  ;;  %v385_v5 = vld [vmem:[#allocation7 + $0x20] sm:$0xff]  ;;  %v384_v6 = vld [vmem:[#allocation7 + $0x18] sm:$0xff]  ;;  %v383_v7 = vld [vmem:[#allocation7 + $0x10] sm:$0xff] }
  0x16   :  { %v382_v8 = vld [vmem:[#allocation7 + $0x8] sm:$0xff]  ;;  %v381_v9 = vld [vmem:[#allocation7] sm:$0xff]  ;;  %v396_v10 = vld [vmem:[#allocation8 + $0x38] sm:$0xff] }
  0x17   :  { %315 = vmatmul.msk.bf16.vlgmr.msra.gmra.mxu0 %vm102_vm0, %v89_v2  ;;  %272 = vmatpush.bf16.msra.mxu2 %v396_v10  ;;  %v395_v11 = vld [vmem:[#allocation8 + $0x30] sm:$0xff]  ;;  %v394_v12 = vld [vmem:[#allocation8 + $0x28] sm:$0xff]  ;;  %v393_v13 = vld [vmem:[#allocation8 + $0x20] sm:$0xff] }
  0x18   :  { %v392_v14 = vld [vmem:[#allocation8 + $0x18] sm:$0xff]  ;;  %v391_v15 = vld [vmem:[#allocation8 + $0x10] sm:$0xff]  ;;  %v390_v22 = vld [vmem:[#allocation8 + $0x8] sm:$0xff] }
  0x19   :  { %190 = vmatpush.bf16.msra.mxu1 %v387_v3  ;;  %v404_v16 = vld [vmem:[%s612_s2] ss:$0 sm:$0xff]  ;;  %v389_v23 = vld [vmem:[#allocation8] sm:$0xff] }
  0x1a   :  { %v405_v24 = vld [vmem:[%s614_s4] ss:$0 sm:$0xff]  ;;  %s545_s4 = smov [#allocation10]  }
  0x1b   :  { %273 = vmatpush.bf16.msra.mxu2 %v395_v11  ;;  %v406_v30 = vld [vmem:[%s616_s6] ss:$0 sm:$0xff]  ;;  %s297_s24 = sshll.u32 %s545_s4, 4  ;;  %s298_s24 = int_to_ptr.vmem [resolvable:$true] %s297_s24 }
  0x1d   :  { %191 = vmatpush.bf16.msra.mxu1 %v386_v4 }
  0x1f   :  { %274 = vmatpush.bf16.msra.mxu2 %v394_v12 }
  0x21   :  { %192 = vmatpush.bf16.msra.mxu1 %v385_v5 }
  0x23   :  { %275 = vmatpush.bf16.msra.mxu2 %v393_v13 }
  0x25   :  { %193 = vmatpush.bf16.msra.mxu1 %v384_v6 }
  0x27   :  { %276 = vmatpush.bf16.msra.mxu2 %v392_v14 }
  0x29   :  { %194 = vmatpush.bf16.msra.mxu1 %v383_v7 }
  0x2b   :  { %277 = vmatpush.bf16.msra.mxu2 %v391_v15 }
  0x2d   :  { %195 = vmatpush.bf16.msra.mxu1 %v382_v8 }
  0x2f   :  { %278 = vmatpush.bf16.msra.mxu2 %v390_v22 }
  0x31   :  { %196 = vmatpush.bf16.msra.mxu1 %v381_v9 }
  0x33   :  { %279 = vmatpush.bf16.msra.mxu2 %v389_v23 }
  0x94   :  { %v115_v17 = vpop.f32.mrf.mxu0 }
  0x95   :  { %v116_v18 = vadd.f32 %v404_v16, %v115_v17 }
  0x97   :  { %v119_v19 = vmax.f32 %v116_v18, 0.0 }
  0x99   :  { %v120_v20 = vpack.c.bf16 %v119_v19, %v119_v19 }
  0x9b   :  { %197 = vmatmul.bf16.vlgmr.msra.gmra.mxu1 %v120_v20 }
  0x9c   :  { %v117_v21 = vpop.f32.mrf.mxu0 }
 0x118   :  { %v198_v25 = vpop.f32.mrf.mxu1 }
 0x119   :  { %v199_v26 = vadd.f32 %v405_v24, %v198_v25 }
 0x11b   :  { %v202_v27 = vmax.f32 %v199_v26, 0.0 }
 0x11d   :  { %v203_v28 = vpack.c.bf16 %v202_v27, %v202_v27 }
 0x11f   :  { %280 = vmatmul.bf16.vlgmr.msra.gmra.mxu2 %v203_v28 }
 0x120   :  { %v200_v29 = vpop.f32.mrf.mxu1 }
 0x1a2   :  { %v281_v31 = vpop.f32.mrf.mxu2 }
 0x1a3   :  { %v282_v32 = vadd.f32 %v406_v30, %v281_v31 }
 0x1a5   :  { %v285_v33 = vsub.f32 0.0, %v282_v32 }
 0x1a7   :  { %v286_v34 = vmul.f32 1.442695, %v285_v33 }
 0x1a9   :  { %407 = vpow2.f32 %v286_v34 }
 0x1aa   :  { %v283_v35 = vpop.f32.mrf.mxu2 }
 0x1af   :  { %v408_v36 = vpop.eup %407 }
 0x1b0   :  { %v288_v37 = vadd.f32 1.0, %v408_v36 }
 0x1b2   :  { %409 = vrcp.f32 %v288_v37 }
 0x1b8   :  { %v410_v38 = vpop.eup %409 }
 0x1b9   :  { %v290_v39 = vpack.c.bf16 %v410_v38, %v410_v38 }
 0x1bb   :  { %291 = vst [vmem:[#allocation10] sm:$0xf] %v290_v39 }
 0x1bc   :  { %302 = dma.vmem_to_hbm [thread:$0]  %s298_s24, 64, %s300_s27, [#allocation4]  }
 0x1bd   :  { %537 = dma.done.wait [#allocation4], 64  }
 0x1be   :  { %538 = vsyncadd [#allocation4], 4294967232 }
 0x1bf   :  { %307 = vsyncpa [#allocation3], 1 }
 0x1c0   :  { %308 = vsyncpa [#allocation6], 1 }
 0x1c1   :  { %309 = vsyncpa [#allocation9], 1 }
 0x1c2   :  { %310 = vsyncpa [#allocation4], 1 }

</bundles_post_ra>
